<compile_context>
chip_gen: v7x
topology: tpu7x:2x2x1
jax: 0.10.0
libtpu: 0.0.40
codegen_flags: <defaults>
</compile_context>

<pallas_src>
import functools

import jax
import jax.numpy as jnp
from jax.experimental import pallas as pl
from jax.experimental.pallas import tpu as pltpu

# ----- Butcher tableau (classic RK4) -------------------------------------
DT = 0.1
A_TABLEAU = ((0.5,),
             (0.0, 0.5),
             (0.0, 0.0, 1.0))
B_TABLEAU = (1.0 / 6.0, 1.0 / 3.0, 1.0 / 3.0, 1.0 / 6.0)

assert all(aij >= 0.0 for ai in A_TABLEAU for aij in ai)
assert all(bi >= 0.0 for bi in B_TABLEAU)


def _rk_kernel(x_ref, w_ref, bias_ref, o_ref, *, dt, a, b, mxu_dtype):
    x = x_ref[...].astype(jnp.float32)      # (TB, D) f32 -- RK state
    w = w_ref[...]                          # (D, D), already in mxu_dtype
    bias = bias_ref[...].astype(jnp.float32)  # (1, D): implicit broadcast in the add
    # (no materialized (TB, D) bias tile -> no 64-vreg live range / spills)

    def update(z):
        # MXU matmul in mxu_dtype (bf16 runs at full MXU rate on all
        # generations), f32 accumulation; tanh + RK combinations stay in f32
        # (v5e has no bf16 VPU/EUP path).
        zz = z.astype(mxu_dtype)
        return jnp.tanh(jnp.dot(zz, w, preferred_element_type=jnp.float32) + bias)

    # Stage 0.
    k = {0: update(x)}

    # Streamed b-weighted sum with the final `x +` folded into the init:
    #   acc = x + sum_i (dt * b_i) * k_i
    # dt is folded into the coefficients at trace time (one fewer full-tile
    # multiply per stage, and removes the 0*inf -> nan edge case) and each k_i
    # is consumed as soon as it is produced, so at most ~2 stage tensors are
    # ever live (no vreg spills at large tb).
    if b[0] != 0.0:
        acc = x + jnp.float32(dt * b[0]) * k[0]
    else:
        acc = x

    for si, ai in enumerate(a, start=1):
        stage_in = x
        for j, aij in enumerate(ai):
            if aij == 0.0:          # skip zero tableau coefficients (RK4: most of them)
                continue
            stage_in = stage_in + jnp.float32(dt * aij) * k[j]
        k_new = update(stage_in)
        if b[si] != 0.0:
            acc = acc + jnp.float32(dt * b[si]) * k_new
        # Dataflow liveness: k_new is only ever read by later a-rows that name
        # it with a nonzero coefficient (for RK4, just the next stage).
        k[si] = k_new

    o_ref[...] = acc.astype(o_ref.dtype)


def _pick_tb(batch, tb_request, min_grid=4):
    """Largest batch tile <= tb_request dividing `batch`, preferring grid >= min_grid.

    grid >= min_grid matters on v7x (2 TensorCores share the 'parallel' axis)
    and keeps the DMA/compute pipeline overlapped; never shrinks below 128 rows.
    """
    tb = max(1, min(tb_request, batch))
    while batch % tb != 0:
        tb -= 1
    while (batch // tb < min_grid) and tb >= 256 and tb % 2 == 0 and batch % (tb // 2) == 0:
        tb //= 2
    if tb != batch and tb % 8 != 0:
        # Partial tiles must satisfy the sublane (8) constraint; fall back to a
        # single full-batch tile (block == full dim is always legal).
        tb = batch
    return tb


def butcher_tableau_step(x, w, bias, *, dt=DT, a=A_TABLEAU, b=B_TABLEAU,
                         tb=512, use_bf16_matmul=True, state_io_dtype=None,
                         vmem_limit_bytes=None):
    """RK step x_{t+1} = x + dt * sum_i b_i k_i with update(x) = tanh(x @ W + bias)."""
    B, D = x.shape
    assert w.shape == (D, D)
    tb = _pick_tb(B, tb)
    assert B % tb == 0, f"batch {B} must be divisible by batch tile {tb}"

    bias2d = bias.reshape(1, D).astype(jnp.float32)
    mxu_dtype = jnp.bfloat16 if use_bf16_matmul else jnp.float32
    # Store W in the MXU dtype in HBM: halves its HBM read and VMEM footprint
    # when bf16 is enabled.
    w_mxu = w.astype(mxu_dtype)

    # Optional narrow state I/O: x in / out are the only HBM terms that scale
    # with B (arithmetic intensity ~D FLOP/byte, below the bf16 ridge on every
    # generation), so halving them is ~2x at bandwidth-bound sizes.
    if state_io_dtype is not None:
        x_in = x.astype(state_io_dtype)
        out_dtype = state_io_dtype
    else:
        x_in = x
        out_dtype = x.dtype

    n_stages = len(b)
    cost = pl.CostEstimate(
        flops=2 * n_stages * B * D * D,
        transcendentals=n_stages * B * D,
        bytes_accessed=(2 * B * D * jnp.dtype(out_dtype).itemsize   # x in + out
                        + D * D * w_mxu.dtype.itemsize              # W
                        + D * 4),                                   # bias
    )

    # W / bias: constant index_map -> fetched once, never re-DMA'd.  For large
    # D, single-buffer W (the second buffer would never be used) to reclaim a
    # full DxD VMEM buffer (matters on v7x's 64 MiB VMEM).
    if D * D * w_mxu.dtype.itemsize > (4 << 20):
        w_spec = pl.BlockSpec((D, D), lambda i: (0, 0),
                              pipeline_mode=pl.Buffered(1))
    else:
        w_spec = pl.BlockSpec((D, D), lambda i: (0, 0))

    compiler_params = pltpu.CompilerParams(
        dimension_semantics=("parallel",),
        vmem_limit_bytes=vmem_limit_bytes,
    )

    kernel = functools.partial(_rk_kernel, dt=dt, a=a, b=b, mxu_dtype=mxu_dtype)

    return pl.pallas_call(
        kernel,
        out_shape=jax.ShapeDtypeStruct((B, D), out_dtype),
        grid_spec=pltpu.PrefetchScalarGridSpec(
            num_scalar_prefetch=0,
            grid=(B // tb,),
            in_specs=[
                pl.BlockSpec((tb, D), lambda i: (i, 0)),   # x tile (pipelined over batch)
                w_spec,
                pl.BlockSpec((1, D), lambda i: (0, 0)),
            ],
            out_specs=pl.BlockSpec((tb, D), lambda i: (i, 0)),
        ),
        compiler_params=compiler_params,
        cost_estimate=cost,
    )(x_in, w_mxu, bias2d)


def butcher_tableau_ref(x, w, bias, *, dt=DT, a=A_TABLEAU, b=B_TABLEAU):
    """Pure-JAX reference mirroring the PyTorch forward exactly."""
    def update(z):
        return jnp.tanh(z @ w + bias)

    k = [update(x)]
    for ai in a:
        weighted_k = (jnp.stack(k, axis=-1) * jnp.asarray(ai, x.dtype)).sum(axis=-1)
        k.append(update(x + dt * weighted_k))
    weighted_k = (jnp.stack(k, axis=-1) * jnp.asarray(b, x.dtype)).sum(axis=-1)
    return x + dt * weighted_k


if __name__ == "__main__":
    key = jax.random.PRNGKey(0)
    kx, kw, kb = jax.random.split(key, 3)

    # Small but MXU/lane-friendly: 512 states of dimension 128 (lane-aligned).
    # The tile picker chooses tb=128 -> grid=4, so both v7x TensorCores get
    # two pipelined steps each.
    B, D = 512, 128
    x = jax.random.normal(kx, (B, D), dtype=jnp.float32)
    w = jax.random.normal(kw, (D, D), dtype=jnp.float32) * 0.05
    bias = jax.random.normal(kb, (D,), dtype=jnp.float32) * 0.01

    ref = butcher_tableau_ref(x, w, bias)

    # f32-MXU path: matches the reference tightly.
    out_f32 = jax.block_until_ready(
        butcher_tableau_step(x, w, bias, use_bf16_matmul=False))
    assert jnp.allclose(out_f32, ref, atol=1e-5, rtol=1e-5), "f32 mismatch vs reference"

    # Default path: bf16 MXU operands, f32 accumulation -> relaxed tolerance.
    out_bf16 = jax.block_until_ready(butcher_tableau_step(x, w, bias))
    assert jnp.allclose(out_bf16, ref, atol=2e-2, rtol=2e-2), "bf16 mismatch vs reference"

    # Narrow state I/O path (bf16 x in / out): halves the dominant HBM term.
    out_io = jax.block_until_ready(
        butcher_tableau_step(x, w, bias, state_io_dtype=jnp.bfloat16))
    assert jnp.allclose(out_io.astype(jnp.float32), ref, atol=5e-2, rtol=5e-2), \
        "bf16-I/O mismatch vs reference"

    # TODO(synk): the PyTorch module takes `update` as an arbitrary callable;
    # here it is fixed to tanh(x @ W + b) — swap _rk_kernel.update for other
    # dynamics nets as needed.
    print("KERNEL_OK")
</pallas_src>

<mosaic_0001>
module attributes {stable_mosaic.version = 11 : i64} {
  func.func @_rk_kernel(%arg0: i32, %arg1: memref<128x128xf32, #tpu.memory_space<vmem>>, %arg2: memref<128x128xf32, #tpu.memory_space<vmem>>, %arg3: memref<1x128xf32, #tpu.memory_space<vmem>>, %arg4: memref<128x128xf32, #tpu.memory_space<vmem>>) attributes {dimension_semantics = [#tpu.dimension_semantics<parallel>], iteration_bounds = array<i64: 4>, scalar_prefetch = 0 : i64, scratch_operands = 0 : i64, tpu.core_type = #tpu.core_type<tc>, window_params = [{transform_indices = @transform_0, window_bounds = array<i64: 128, 128>}, {pipeline_mode = #tpu.pipeline_mode<synchronous>, transform_indices = @transform_1, window_bounds = array<i64: 128, 128>}, {pipeline_mode = #tpu.pipeline_mode<synchronous>, transform_indices = @transform_2, window_bounds = array<i64: 1, 128>}, {transform_indices = @transform_3, window_bounds = array<i64: 128, 128>}]} {
    %c0 = arith.constant 0 : index
    %c0_0 = arith.constant 0 : index
    %0 = vector.load %arg1[%c0, %c0_0] : memref<128x128xf32, #tpu.memory_space<vmem>>, vector<128x128xf32>
    %c0_1 = arith.constant 0 : index
    %c0_2 = arith.constant 0 : index
    %1 = vector.load %arg2[%c0_1, %c0_2] : memref<128x128xf32, #tpu.memory_space<vmem>>, vector<128x128xf32>
    %c0_3 = arith.constant 0 : index
    %c0_4 = arith.constant 0 : index
    %2 = vector.load %arg3[%c0_3, %c0_4] : memref<1x128xf32, #tpu.memory_space<vmem>>, vector<1x128xf32>
    %cst = arith.constant dense<0.000000e+00> : vector<128x128xf32>
    %3 = tpu.matmul %0, %1, %cst {dimension_numbers = #tpu.dot_dimension_numbers<[1], [0], [0], [1], [0, 0, 1, 1], [], []>} : vector<128x128xf32>, vector<128x128xf32>, vector<128x128xf32> -> vector<128x128xf32>
    %4 = vector.broadcast %2 : vector<1x128xf32> to vector<128x128xf32>
    %5 = arith.addf %3, %4 : vector<128x128xf32>
    %6 = math.tanh %5 : vector<128x128xf32>
    %cst_5 = arith.constant 0.0166666675 : f32
    %7 = vector.broadcast %cst_5 : f32 to vector<128x128xf32>
    %8 = arith.mulf %7, %6 : vector<128x128xf32>
    %9 = arith.addf %0, %8 : vector<128x128xf32>
    %cst_6 = arith.constant 5.000000e-02 : f32
    %10 = vector.broadcast %cst_6 : f32 to vector<128x128xf32>
    %11 = arith.mulf %10, %6 : vector<128x128xf32>
    %12 = arith.addf %0, %11 : vector<128x128xf32>
    %cst_7 = arith.constant dense<0.000000e+00> : vector<128x128xf32>
    %13 = tpu.matmul %12, %1, %cst_7 {dimension_numbers = #tpu.dot_dimension_numbers<[1], [0], [0], [1], [0, 0, 1, 1], [], []>} : vector<128x128xf32>, vector<128x128xf32>, vector<128x128xf32> -> vector<128x128xf32>
    %14 = vector.broadcast %2 : vector<1x128xf32> to vector<128x128xf32>
    %15 = arith.addf %13, %14 : vector<128x128xf32>
    %16 = math.tanh %15 : vector<128x128xf32>
    %cst_8 = arith.constant 0.0333333351 : f32
    %17 = vector.broadcast %cst_8 : f32 to vector<128x128xf32>
    %18 = arith.mulf %17, %16 : vector<128x128xf32>
    %19 = arith.addf %9, %18 : vector<128x128xf32>
    %cst_9 = arith.constant 5.000000e-02 : f32
    %20 = vector.broadcast %cst_9 : f32 to vector<128x128xf32>
    %21 = arith.mulf %20, %16 : vector<128x128xf32>
    %22 = arith.addf %0, %21 : vector<128x128xf32>
    %cst_10 = arith.constant dense<0.000000e+00> : vector<128x128xf32>
    %23 = tpu.matmul %22, %1, %cst_10 {dimension_numbers = #tpu.dot_dimension_numbers<[1], [0], [0], [1], [0, 0, 1, 1], [], []>} : vector<128x128xf32>, vector<128x128xf32>, vector<128x128xf32> -> vector<128x128xf32>
    %24 = vector.broadcast %2 : vector<1x128xf32> to vector<128x128xf32>
    %25 = arith.addf %23, %24 : vector<128x128xf32>
    %26 = math.tanh %25 : vector<128x128xf32>
    %cst_11 = arith.constant 0.0333333351 : f32
    %27 = vector.broadcast %cst_11 : f32 to vector<128x128xf32>
    %28 = arith.mulf %27, %26 : vector<128x128xf32>
    %29 = arith.addf %19, %28 : vector<128x128xf32>
    %cst_12 = arith.constant 1.000000e-01 : f32
    %30 = vector.broadcast %cst_12 : f32 to vector<128x128xf32>
    %31 = arith.mulf %30, %26 : vector<128x128xf32>
    %32 = arith.addf %0, %31 : vector<128x128xf32>
    %cst_13 = arith.constant dense<0.000000e+00> : vector<128x128xf32>
    %33 = tpu.matmul %32, %1, %cst_13 {dimension_numbers = #tpu.dot_dimension_numbers<[1], [0], [0], [1], [0, 0, 1, 1], [], []>} : vector<128x128xf32>, vector<128x128xf32>, vector<128x128xf32> -> vector<128x128xf32>
    %34 = vector.broadcast %2 : vector<1x128xf32> to vector<128x128xf32>
    %35 = arith.addf %33, %34 : vector<128x128xf32>
    %36 = math.tanh %35 : vector<128x128xf32>
    %cst_14 = arith.constant 0.0166666675 : f32
    %37 = vector.broadcast %cst_14 : f32 to vector<128x128xf32>
    %38 = arith.mulf %37, %36 : vector<128x128xf32>
    %39 = arith.addf %29, %38 : vector<128x128xf32>
    %c0_15 = arith.constant 0 : index
    %c0_16 = arith.constant 0 : index
    %40 = vector.load %arg4[%c0_15, %c0_16] : memref<128x128xf32, #tpu.memory_space<vmem>>, vector<128x128xf32>
    tpu.vector_store %arg4[%c0_15, %c0_16], %39 {strides = array<i32>} : memref<128x128xf32, #tpu.memory_space<vmem>>, vector<128x128xf32>,
    return
  }
  func.func @transform_0(%arg0: i32) -> (i32, i32) {
    %c0_i32 = arith.constant 0 : i32
    %c0_i32_0 = arith.constant 0 : i32
    return %arg0, %c0_i32 : i32, i32
  }
  func.func @transform_1(%arg0: i32) -> (i32, i32) {
    %c0_i32 = arith.constant 0 : i32
    %c0_i32_0 = arith.constant 0 : i32
    %c0_i32_1 = arith.constant 0 : i32
    return %c0_i32, %c0_i32_0 : i32, i32
  }
  func.func @transform_2(%arg0: i32) -> (i32, i32) {
    %c0_i32 = arith.constant 0 : i32
    %c0_i32_0 = arith.constant 0 : i32
    %c0_i32_1 = arith.constant 0 : i32
    return %c0_i32, %c0_i32_0 : i32, i32
  }
  func.func @transform_3(%arg0: i32) -> (i32, i32) {
    %c0_i32 = arith.constant 0 : i32
    %c0_i32_0 = arith.constant 0 : i32
    return %arg0, %c0_i32 : i32, i32
  }
}

</mosaic_0001>

<bundles_post_ra>
// kernel: tpu_custom_call.1
= control target key start
LH: loop header
LB: loop body
LE: loop exit
PB: predicated region body
PF: predicated region fallthrough
CT: control target
= control target key end

     0   :  { %8 = vsyncpa [#allocation3], 0  ;;  %s2732_s0 = inlined_call_operand.hbm [shape: f32[512,128], index: 0, kind: input, shape index: {}]   ;;  %s2733_s1 = inlined_call_operand.hbm [shape: f32[128,128], index: 1, kind: input, shape index: {}]   ;;  %s2734_s2 = inlined_call_operand.vmem [shape: f32[1,128], index: 2, kind: input, shape index: {}]   ;;  %s2735_s3 = inlined_call_operand.hbm [shape: f32[512,128], index: 3, kind: output, shape index: {}]  }
   0x1   :  { %10 = vsyncpa [#allocation3 + $0x1], 0 }
   0x2   :  { %11 = vsyncpa [#allocation6], 0 }
   0x3   :  { %12 = vsyncpa [#allocation4], 0 }
   0x4   :  { %14 = vsyncpa [#allocation4 + $0x1], 0  ;;  %s2072_s12 = smov 0   ;;  %s2074_s13 = smov 0  }
   0x5   :  { %s2076_s14 = smov 0   ;;  %s2078_s15 = smov 0  }
   0x6 LB: > { %s2093_s16 = sadd.s32 4294967295, %s2043_s15   ;;  %s1226_s17 = sadd.s32 4294967294, %s2043_s15   ;;  %s2043_s15 = sphi %s2078_s15, %s2754_s15   ;;  %s2039_s14 = sphi %s2076_s14, %s2753_s14   ;;  %s2035_s13 = sphi %s2074_s13, %s2752_s13   ;;  %s2031_s12 = sphi %s2072_s12, %s2751_s12  }
   0x7   : > { %p40_p0 = scmp.ne.s32.totalorder %s2035_s13, %s2031_s12  ;;  %p2736_p1 = scmp.eq.s32.totalorder %s2093_s16, 0 }
   0x8   : > { %p112_p3 = scmp.eq.s32.totalorder %s1226_s17, 3  ;;  %p1227_p5 = scmp.ge.s32.totalorder %s2043_s15, 1 }
   0x9   : > { %p2102_p4 = por %p2736_p1, %p40_p0  ;;  %p119_p7 = scmp.lt.s32.totalorder %s2043_s15, 5 }
   0xa   : > { %p2107_p6 = por %p112_p3, %p40_p0  ;;  %s2045_s21 = smov [#allocation5]  }
   0xb   : > { %s2739_s18 = scalar_select %p2102_p4, 1, 0 }
   0xc   : > { %s2740_s19 = scalar_select %p2107_p6, 1, 0 }
   0xd   : > { %p2112_p8 = pnand %p1227_p5, %p119_p7  ;;  %s131_s22 = sshll.u32 %s2045_s21, 4  ;;  %s132_s22 = int_to_ptr.vmem [resolvable:$true] %s131_s22 }
   0xe   : > { %s2125_s24 = sadd.s32 1, %s2043_s15   ;;  %s27_s25 = sadd.s32 1, %s2039_s14 }
   0xf   : > { %s2741_s20 = scalar_select %p2112_p8, 1, 0 }
  0x10   : > { %p1733_p9 = pneg %p2112_p8  ;;  %s24_s26 = ssub.s32 %s2043_s15, %s2125_s24 }
  0x11   : > { %s1915_s29 = scalar_lea.hbm %s2733_s1, 2048 }
  0x12   : > { %p2120_p10 = pnand %p1733_p9, %p2736_p1  ;;  %p1916_p11 = scmp.ne.s32.totalorder %s2733_s1, %s1915_s29 }
  0x13   : > { %p1922_p3 = scmp.lt.u32.totalorder %s1915_s29, %s2733_s1 }
  0x14   : > { %p1917_p12 = pneg %p2120_p10 }
  0x16   : > { %p1918_p13 = pnand %p1917_p12, %p1916_p11 }
  0x18   : > { %p1919_p0 = pneg %p1918_p13 }
  0x1a   : > { %p1924_p5 = pnand %p1922_p3, %p1919_p0 }
  0x1c   : > { %1927 = shalt.err (!%p1924_p5)
}
  0x1d   : > { %s1928_s7 = scalar_lea.vmem %s132_s22, 2048  ;;  %p1936_p2 = scmp.lt.s32.totalorder %s132_s22, %s132_s22 }
  0x1e   : > { %p1929_p7 = scmp.ne.s32.totalorder %s132_s22, %s1928_s7  ;;  %p1937_p6 = scmp.lt.s32.totalorder %s1928_s7, %s1928_s7 }
  0x20   : > { %p1931_p9 = pnand %p1929_p7, %p1917_p12  ;;  %p1938_p4 = por %p1937_p6, %p1936_p2 }
  0x22   : > { %p1932_p1 = pneg %p1931_p9 }
  0x24   : > { %p1939_p8 = pnand %p1938_p4, %p1932_p1 }
  0x26   : > { %1942 = shalt.err (!%p1939_p8)
}
  0x27   : > { %s2046_s8 = smov 128   ;;  %s2047_s9 = smov 8  }
  0x28   : > { %1736 = dma.hbm_to_vmem [thread:$0]  (!%p2120_p10), %s2733_s1, 2048, %s132_s22, [#allocation6], %s2046_s8, %s2046_s8, %s2047_s9  }
  0x29   : > { %p25_p1 = scmp.eq.s32.totalorder %s24_s26, 0  ;;  %p34_p2 = scmp.ne.s32.totalorder %s2039_s14, %s2035_s13 }
  0x2a   : > { %p35_p4 = scmp.eq.s32.totalorder %s2043_s15, 0  ;;  %p1746_p6 = scmp.lt.s32.totalorder %s2043_s15, 4 }
  0x2b   : > { %s2154_s17 = scalar_select %p25_p1, %s2039_s14, %s27_s25  }
  0x2c   : > { %p36_p8 = por %p35_p4, %p34_p2  ;;  %p2743_p11 = scmp.eq.s32.totalorder %s2093_s16, 3 }
  0x2d   : > { %s148_s23 = sand.u32 1, %s2039_s14   ;;  %s1243_s27 = sshll.u32 %s2043_s15, 11 }
  0x2e   : > { %p2158_p12 = por %p2743_p11, %p34_p2  ;;  %s1230_s28 = sshll.u32 %s148_s23, 7 }
  0x2f   : > { %s2167_s4 = scalar_lea.hbm %s2732_s0, %s1243_s27  ;;  %s152_s22 = scalar_lea.vmem [#allocation2], %s1230_s28 }
  0x30   : > { %s159_s25 = sshll.u32 %s152_s22, 4  ;;  %p2169_p10 = pnand %p1746_p6, %p36_p8  ;;  %s2173_s25 = int_to_ptr.vmem [resolvable:$true] %s159_s25 }
  0x31   : > { %s2175_s5 = scalar_lea.sflag [#allocation3], %s148_s23  ;;  %s1943_s6 = scalar_lea.hbm %s2167_s4, 2048 }
  0x32   : > { %p1944_p13 = scmp.ne.s32.totalorder %s2167_s4, %s1943_s6  ;;  %p1945_p0 = pneg %p2169_p10 }
  0x33   : > { %s1948_s11 = scalar_lea.hbm %s2732_s0, 8192  ;;  %p1949_p7 = scmp.lt.u32.totalorder %s2167_s4, %s2732_s0 }
  0x34   : > { %p1946_p3 = pnand %p1945_p0, %p1944_p13  ;;  %p1950_p9 = scmp.lt.u32.totalorder %s1948_s11, %s1943_s6 }
  0x35   : > { %p1952_p2 = scmp.lt.u32.totalorder %s1943_s6, %s2167_s4 }
  0x36   : > { %p1947_p5 = pneg %p1946_p3  ;;  %p1951_p1 = por %p1950_p9, %p1949_p7 }
  0x38   : > { %p1953_p4 = por %p1952_p2, %p1951_p1 }
  0x3a   : > { %p1954_p6 = pnand %p1953_p4, %p1947_p5 }
  0x3c   : > { %1957 = shalt.err (!%p1954_p6)
}
  0x3d   : > { %s1958_s23 = scalar_lea.vmem %s2173_s25, 2048  ;;  %s2048_s29 = smov [#allocation2]  }
  0x3e   : > { %p1959_p8 = scmp.ne.s32.totalorder %s2173_s25, %s1958_s23  ;;  %s1963_s30 = sshll.u32 %s2048_s29, 4  ;;  %s1964_s30 = int_to_ptr.vmem [resolvable:$false] %s1963_s30 }
  0x3f   : > { %s1965_s22 = scalar_lea.vmem %s1964_s30, 4096  ;;  %p1966_p3 = scmp.lt.s32.totalorder %s2173_s25, %s1964_s30 }
  0x40   : > { %p1961_p11 = pnand %p1959_p8, %p1945_p0  ;;  %p1967_p7 = scmp.lt.s32.totalorder %s1965_s22, %s1958_s23 }
  0x42   : > { %p1962_p13 = pneg %p1961_p11  ;;  %p1968_p9 = por %p1967_p7, %p1966_p3 }
  0x44   : > { %p1969_p1 = pnand %p1968_p9, %p1962_p13 }
  0x46   : > { %1972 = shalt.err (!%p1969_p1)
}
  0x47   : > { %1740 = dma.hbm_to_vmem [thread:$0]  (!%p2169_p10), %s2167_s4, 2048, %s2173_s25, %s2175_s5, %s2046_s8, %s2046_s8, %s2047_s9  }
  0x48   : > { %p2746_p0 = scmp.ne.s32.totalorder %s2741_s20, 0 }
  0x49   : > { %s2209_s6 = sand.u32 (!%p2746_p0), 1, %s2035_s13   ;;  %p2747_p5 = scmp.ne.s32.totalorder (!%p2746_p0), %s2739_s18, 0 }
  0x4a   : > { %171 = sbr.rel (%p2746_p0) target bundleno = 1086 (0x43e), region = 32  ;;  %s1234_s7 = sshll.u32 (!%p2746_p0), %s2209_s6, 7 }
  0x4b   : > { %s174_s10 = scalar_lea.sflag (!%p2746_p0), [#allocation3], %s2209_s6  ;;  %s2215_s26 = scalar_lea.vmem (!%p2746_p0), [#allocation2], %s1234_s7 }
  0x51   : > { %2018 = dma.done.wait (%p2747_p5), %s174_s10, 2048  }
  0x52   : > { %2020 = vsyncadd (%p2747_p5), %s174_s10, 4294965248  ;;  %p2748_p10 = scmp.eq.s32.totalorder %s2093_s16, 0 }
  0x54   : > { %2022 = dma.done.wait (%p2748_p10), [#allocation6], 2048   ;;  %p2749_p2 = pmov %p2748_p10 }
  0x55   : > { %v222_v0 = vld [vmem:[#allocation5] sm:$0xff]  ;;  %v223_v1 = vld [vmem:[#allocation5 + $0x8] sm:$0xff]  ;;  %v224_v2 = vld [vmem:[#allocation5 + $0x10] sm:$0xff]  ;;  %s2643_s8 = scalar_lea.vmem [#allocation7], %s1234_s7  ;;  %s1244_s25 = sshll.u32 %s2093_s16, 11 }
  0x56   : > { %2024 = vsyncadd (%p2749_p2), [#allocation6], 4294965248  ;;  %v2225_v3 = vpack.c.bf16 %v223_v1, %v222_v0  ;;  %v225_v4 = vld [vmem:[#allocation5 + $0x18] sm:$0xff]  ;;  %v226_v6 = vld [vmem:[#allocation5 + $0x20] sm:$0xff]  ;;  %s1143_s5 = sshll.u32 %s2643_s8, 4  ;;  %s2684_s28 = scalar_lea.hbm %s2735_s3, %s1244_s25  ;;  %s2686_s5 = int_to_ptr.vmem [resolvable:$true] %s1143_s5 }
  0x57   : > { %v2227_v5 = vpack.c.bf16 %v225_v4, %v224_v2  ;;  %v227_v7 = vld [vmem:[#allocation5 + $0x28] sm:$0xff]  ;;  %v2237_v9 = vld [vmem:[%s2215_s26] sm:$0xff]  ;;  %v228_v10 = vld [vmem:[#allocation5 + $0x30] sm:$0xff]  ;;  %s1130_s16 = scalar_lea.sflag [#allocation4], %s2209_s6  ;;  %s1973_s23 = scalar_lea.vmem %s2686_s5, 2048 }
  0x58   : > { %1598 = vmatprep.subr.bf16.mxu0 %v2225_v3  ;;  %1630 = vmatprep.subr.bf16.mxu1 %v2225_v3  ;;  %v2234_v8 = vpack.c.bf16 %v227_v7, %v226_v6  ;;  %v229_v11 = vld [vmem:[#allocation5 + $0x38] sm:$0xff]  ;;  %v230_v13 = vld [vmem:[#allocation5 + $0x40] sm:$0xff]  ;;  %v231_v14 = vld [vmem:[#allocation5 + $0x48] sm:$0xff]  ;;  %p1974_p4 = scmp.ne.s32.totalorder %s2686_s5, %s1973_s23  ;;  %s2049_s29 = smov [#allocation7]  }
  0x59   : > { %1600 = vmatpush3.bf16.msra.mxu0 %v2225_v3  ;;  %1632 = vmatpush3.bf16.msra.mxu1 %v2225_v3  ;;  %v2244_v12 = vpack.c.bf16 %v229_v11, %v228_v10  ;;  %v2250_v15 = vpack.c.bf16 %v231_v14, %v230_v13  ;;  %v232_v16 = vld [vmem:[#allocation5 + $0x50] sm:$0xff]  ;;  %v233_v17 = vld [vmem:[#allocation5 + $0x58] sm:$0xff]  ;;  %v234_v19 = vld [vmem:[#allocation5 + $0x60] sm:$0xff]  ;;  %s1977_s30 = sshll.u32 %s2049_s29, 4  ;;  %s1978_s30 = int_to_ptr.vmem [resolvable:$false] %s1977_s30 }
  0x5a   : > { %1602 = vmatprep.subr.bf16.mxu0 %v2227_v5  ;;  %1634 = vmatprep.subr.bf16.mxu1 %v2227_v5  ;;  %v2256_v18 = vpack.c.bf16 %v233_v17, %v232_v16  ;;  %v235_v20 = vld [vmem:[#allocation5 + $0x68] sm:$0xff]  ;;  %v236_v22 = vld [vmem:[#allocation5 + $0x70] sm:$0xff]  ;;  %v237_v23 = vld [vmem:[#allocation5 + $0x78] sm:$0xff]  ;;  %p1975_p6 = pnand %p1974_p4, %p2158_p12  ;;  %s1979_s22 = scalar_lea.vmem %s1978_s30, 4096 }
  0x5b   : > { %1405 = vmatprep.mubr.f32.mxu0 %v2237_v9  ;;  %v2262_v21 = vpack.c.bf16 %v235_v20, %v234_v19  ;;  %v2268_v24 = vpack.c.bf16 %v237_v23, %v236_v22  ;;  %v2277_v25 = vld [vmem:[%s2215_s26 + $0x8] sm:$0xff]  ;;  %v2281_v26 = vld [vmem:[%s2215_s26 + $0x10] sm:$0xff]  ;;  %v2288_v27 = vld [vmem:[%s2215_s26 + $0x18] sm:$0xff]  ;;  %p1980_p11 = scmp.lt.s32.totalorder %s2686_s5, %s1978_s30  ;;  %p1981_p13 = scmp.lt.s32.totalorder %s1979_s22, %s1973_s23 }
  0x5c   : > { %v2292_v28 = vld [vmem:[%s2215_s26 + $0x20] sm:$0xff]  ;;  %v2298_v29 = vld [vmem:[%s2215_s26 + $0x28] sm:$0xff]  ;;  %v2302_v30 = vld [vmem:[%s2215_s26 + $0x30] sm:$0xff]  ;;  %p1976_p8 = pneg %p1975_p6 }
  0x5d   : > { %1604 = vmatpush3.bf16.msra.mxu0 %v2227_v5  ;;  %1636 = vmatpush3.bf16.msra.mxu1 %v2227_v5  ;;  %v2308_v31 = vld [vmem:[%s2215_s26 + $0x38] sm:$0xff]  ;;  %v2312_v32 = vld [vmem:[%s2215_s26 + $0x40] sm:$0xff]  ;;  %v2318_v33 = vld [vmem:[%s2215_s26 + $0x48] sm:$0xff]  ;;  %p1982_p3 = por %p1981_p13, %p1980_p11 }
  0x5e   : > { %1606 = vmatprep.subr.bf16.mxu0 %v2234_v8  ;;  %1638 = vmatprep.subr.bf16.mxu1 %v2234_v8  ;;  %v2322_v34 = vld [vmem:[%s2215_s26 + $0x50] sm:$0xff]  ;;  %v2328_v35 = vld [vmem:[%s2215_s26 + $0x58] sm:$0xff]  ;;  %v2332_v36 = vld [vmem:[%s2215_s26 + $0x60] sm:$0xff] }
  0x5f   : > { %v2338_v37 = vld [vmem:[%s2215_s26 + $0x68] sm:$0xff]  ;;  %v2342_v38 = vld [vmem:[%s2215_s26 + $0x70] sm:$0xff]  ;;  %v2348_v39 = vld [vmem:[%s2215_s26 + $0x78] sm:$0xff]  ;;  %p1983_p7 = pnand %p1982_p3, %p1976_p8 }
  0x60   : > { %v2357_v40 = vld [vmem:[%s2734_s2] ss:$0 sm:$0xff] }
  0x61   : > { %1608 = vmatpush3.bf16.msra.mxu0 %v2234_v8  ;;  %1640 = vmatpush3.bf16.msra.mxu1 %v2234_v8 }
  0x62   : > { %1610 = vmatprep.subr.bf16.mxu0 %v2244_v12  ;;  %1642 = vmatprep.subr.bf16.mxu1 %v2244_v12 }
  0x65   : > { %1612 = vmatpush3.bf16.msra.mxu0 %v2244_v12  ;;  %1644 = vmatpush3.bf16.msra.mxu1 %v2244_v12 }
  0x66   : > { %1614 = vmatprep.subr.bf16.mxu0 %v2250_v15  ;;  %1646 = vmatprep.subr.bf16.mxu1 %v2250_v15 }
  0x69   : > { %1616 = vmatpush3.bf16.msra.mxu0 %v2250_v15  ;;  %1648 = vmatpush3.bf16.msra.mxu1 %v2250_v15 }
  0x6a   : > { %1618 = vmatprep.subr.bf16.mxu0 %v2256_v18  ;;  %1650 = vmatprep.subr.bf16.mxu1 %v2256_v18 }
  0x6d   : > { %1620 = vmatpush3.bf16.msra.mxu0 %v2256_v18  ;;  %1652 = vmatpush3.bf16.msra.mxu1 %v2256_v18 }
  0x6e   : > { %1622 = vmatprep.subr.bf16.mxu0 %v2262_v21  ;;  %1654 = vmatprep.subr.bf16.mxu1 %v2262_v21 }
  0x71   : > { %1624 = vmatpush3.bf16.msra.mxu0 %v2262_v21  ;;  %1656 = vmatpush3.bf16.msra.mxu1 %v2262_v21 }
  0x72   : > { %1626 = vmatprep.subr.bf16.mxu0 %v2268_v24  ;;  %1658 = vmatprep.subr.bf16.mxu1 %v2268_v24 }
  0x75   : > { %1628 = vmatpush3.bf16.msra.mxu0 %v2268_v24  ;;  %1660 = vmatpush3.bf16.msra.mxu1 %v2268_v24 }
  0x76   : > { %1662 = vmatprep.subr.bf16.mxu0 %v2225_v3  ;;  %1694 = vmatprep.subr.bf16.mxu1 %v2225_v3 }
  0x78   : > { %1406 = vmatmul.mubr.f32.vlgmr.msra.gmra.mrb[0].mxu0 %v2277_v25 }
  0x79   : > { %1408 = vmatprep.mubr.f32.mxu0 %v2281_v26  ;;  %1664 = vmatpush3.bf16.msra.mxu0 %v2225_v3 }
  0x7a   : > { %1666 = vmatprep.subr.bf16.mxu0 %v2227_v5 }
  0x7c   : > { %1409 = vmatmul.mubr.f32.gmra.mrb[2].mxu0 %v2288_v27 }
  0x7d   : > { %1411 = vmatprep.mubr.f32.mxu0 %v2292_v28  ;;  %1668 = vmatpush3.bf16.msra.mxu0 %v2227_v5 }
  0x7e   : > { %1670 = vmatprep.subr.bf16.mxu0 %v2234_v8 }
  0x80   : > { %1412 = vmatmul.mubr.f32.gmra.mrb[4].mxu0 %v2298_v29 }
  0x81   : > { %1414 = vmatprep.mubr.f32.mxu0 %v2302_v30  ;;  %1672 = vmatpush3.bf16.msra.mxu0 %v2234_v8 }
  0x82   : > { %1674 = vmatprep.subr.bf16.mxu0 %v2244_v12 }
  0x84   : > { %1415 = vmatmul.mubr.f32.gmra.mrb[6].mxu0 %v2308_v31 }
  0x85   : > { %1417 = vmatprep.mubr.f32.mxu0 %v2312_v32  ;;  %1676 = vmatpush3.bf16.msra.mxu0 %v2244_v12 }
  0x86   : > { %1678 = vmatprep.subr.bf16.mxu0 %v2250_v15 }
  0x88   : > { %1418 = vmatmul.mubr.f32.gmra.mrb[8].mxu0 %v2318_v33 }
  0x89   : > { %1420 = vmatprep.mubr.f32.mxu0 %v2322_v34  ;;  %1680 = vmatpush3.bf16.msra.mxu0 %v2250_v15 }
  0x8a   : > { %1682 = vmatprep.subr.bf16.mxu0 %v2256_v18 }
  0x8c   : > { %1421 = vmatmul.mubr.f32.gmra.mrb[10].mxu0 %v2328_v35 }
  0x8d   : > { %1423 = vmatprep.mubr.f32.mxu0 %v2332_v36  ;;  %1684 = vmatpush3.bf16.msra.mxu0 %v2256_v18 }
  0x8e   : > { %1686 = vmatprep.subr.bf16.mxu0 %v2262_v21 }
  0x90   : > { %1424 = vmatmul.mubr.f32.gmra.mrb[12].mxu0 %v2338_v37 }
  0x91   : > { %1426 = vmatprep.mubr.f32.mxu0 %v2342_v38  ;;  %1688 = vmatpush3.bf16.msra.mxu0 %v2262_v21 }
  0x92   : > { %1690 = vmatprep.subr.bf16.mxu0 %v2268_v24 }
  0x94   : > { %1427 = vmatmul.mubr.f32.gmra.mrb[14].mxu0 %v2348_v39 }
  0x95   : > { %1692 = vmatpush3.bf16.msra.mxu0 %v2268_v24 }
 0x14b   : > { %v1407_v41 = vpop.f32.mrb[0].mxu0 }
 0x14c   : > { %v317_v42 = vadd.f32 %v1407_v41, %v2357_v40  ;;  %v311_v43 = vpop.f32.mrb[1].mxu0 }
 0x14d   : > { %v312_v44 = vadd.f32 %v2357_v40, %v311_v43 }
 0x14e   : > { %1786 = vtanh.f32 %v317_v42 }
 0x14f   : > { %1788 = vtanh.f32 %v312_v44  ;;  %v1410_v45 = vpop.f32.mrb[2].mxu0 }
 0x150   : > { %v327_v46 = vadd.f32 %v1410_v45, %v2357_v40  ;;  %v321_v47 = vpop.f32.mrb[3].mxu0 }
 0x151   : > { %v322_v48 = vadd.f32 %v2357_v40, %v321_v47 }
 0x152   : > { %1790 = vtanh.f32 %v327_v46 }
 0x153   : > { %1792 = vtanh.f32 %v322_v48  ;;  %v1413_v49 = vpop.f32.mrb[4].mxu0 }
 0x154   : > { %v337_v50 = vadd.f32 %v1413_v49, %v2357_v40  ;;  %v331_v51 = vpop.f32.mrb[5].mxu0 }
 0x155   : > { %v332_v52 = vadd.f32 %v2357_v40, %v331_v51 }
 0x156   : > { %1794 = vtanh.f32 %v337_v50 }
 0x157   : > { %1796 = vtanh.f32 %v332_v52  ;;  %v1416_v53 = vpop.f32.mrb[6].mxu0 }
 0x158   : > { %v2365_v54 = vpop.eup %1786  ;;  %v347_v55 = vadd.f32 %v1416_v53, %v2357_v40  ;;  %v341_v56 = vpop.f32.mrb[7].mxu0 }
 0x159   : > { %v2368_v57 = vpop.eup %1788  ;;  %v342_v58 = vadd.f32 %v2357_v40, %v341_v56  ;;  %v439_v59 = vmul.f32 0.05, %v2365_v54 }
 0x15a   : > { %1798 = vtanh.f32 %v347_v55  ;;  %v438_v60 = vmul.f32 0.05, %v2368_v57 }
 0x15b   : > { %1800 = vtanh.f32 %v342_v58  ;;  %v1419_v61 = vpop.f32.mrb[8].mxu0  ;;  %v455_v6 = vadd.f32 %v439_v59, %v2277_v25 }
 0x15c   : > { %v2373_v62 = vpop.eup %1790  ;;  %v357_v63 = vadd.f32 %v1419_v61, %v2357_v40  ;;  %v351_v0 = vpop.f32.mrb[9].mxu0  ;;  %v454_v1 = vadd.f32 %v438_v60, %v2237_v9 }
 0x15d   : > { %v2377_v2 = vpop.eup %1792  ;;  %v352_v4 = vadd.f32 %v2357_v40, %v351_v0  ;;  %v441_v7 = vmul.f32 0.05, %v2373_v62 }
 0x15e   : > { %1802 = vtanh.f32 %v357_v63  ;;  %1461 = vmatprep.mubr.f32.mxu1 %v454_v1  ;;  %v440_v10 = vmul.f32 0.05, %v2377_v2 }
 0x15f   : > { %1804 = vtanh.f32 %v352_v4  ;;  %v1422_v11 = vpop.f32.mrb[10].mxu0  ;;  %1462 = vmatmul.mubr.f32.vlgmr.msra.gmra.mrb[0].mxu1 %v455_v6  ;;  %v457_v22 = vadd.f32 %v441_v7, %v2288_v27 }
 0x160   : > { %v2383_v13 = vpop.eup %1794  ;;  %v367_v14 = vadd.f32 %v1422_v11, %v2357_v40  ;;  %v361_v16 = vpop.f32.mrb[11].mxu0  ;;  %v456_v17 = vadd.f32 %v440_v10, %v2281_v26  ;;  %1696 = vmatpush3.bf16.msra.mxu1 %v2225_v3 }
 0x161   : > { %v2388_v19 = vpop.eup %1796  ;;  %v362_v20 = vadd.f32 %v2357_v40, %v361_v16  ;;  %v443_v23 = vmul.f32 0.05, %v2383_v13  ;;  %1698 = vmatprep.subr.bf16.mxu1 %v2227_v5 }
 0x162   : > { %1806 = vtanh.f32 %v367_v14  ;;  %1464 = vmatprep.mubr.f32.mxu1 %v456_v17  ;;  %v442_v41 = vmul.f32 0.05, %v2388_v19 }
 0x163   : > { %1808 = vtanh.f32 %v362_v20  ;;  %v1425_v42 = vpop.f32.mrb[12].mxu0  ;;  %1465 = vmatmul.mubr.f32.gmra.mrb[2].mxu1 %v457_v22  ;;  %v459_v48 = vadd.f32 %v443_v23, %v2298_v29 }
 0x164   : > { %v2395_v43 = vpop.eup %1798  ;;  %v377_v3 = vadd.f32 %v1425_v42, %v2357_v40  ;;  %v371_v44 = vpop.f32.mrb[13].mxu0  ;;  %v458_v45 = vadd.f32 %v442_v41, %v2292_v28  ;;  %1700 = vmatpush3.bf16.msra.mxu1 %v2227_v5 }
 0x165   : > { %v2400_v46 = vpop.eup %1800  ;;  %v372_v47 = vadd.f32 %v2357_v40, %v371_v44  ;;  %v445_v49 = vmul.f32 0.05, %v2395_v43  ;;  %1702 = vmatprep.subr.bf16.mxu1 %v2234_v8 }
 0x166   : > { %1810 = vtanh.f32 %v377_v3  ;;  %1467 = vmatprep.mubr.f32.mxu1 %v458_v45  ;;  %v444_v50 = vmul.f32 0.05, %v2400_v46 }
 0x167   : > { %1812 = vtanh.f32 %v372_v47  ;;  %v1428_v51 = vpop.f32.mrb[14].mxu0  ;;  %1468 = vmatmul.mubr.f32.gmra.mrb[4].mxu1 %v459_v48  ;;  %v461_v59 = vadd.f32 %v445_v49, %v2308_v31 }
 0x168   : > { %v2407_v52 = vpop.eup %1802  ;;  %v387_v5 = vadd.f32 %v1428_v51, %v2357_v40  ;;  %v381_v53 = vpop.f32.mrb[15].mxu0  ;;  %v460_v55 = vadd.f32 %v444_v50, %v2302_v30  ;;  %1704 = vmatpush3.bf16.msra.mxu1 %v2234_v8 }
 0x169   : > { %v2412_v56 = vpop.eup %1804  ;;  %v382_v58 = vadd.f32 %v2357_v40, %v381_v53  ;;  %v447_v60 = vmul.f32 0.05, %v2407_v52  ;;  %1706 = vmatprep.subr.bf16.mxu1 %v2244_v12 }
 0x16a   : > { %1814 = vtanh.f32 %v387_v5  ;;  %1470 = vmatprep.mubr.f32.mxu1 %v460_v55  ;;  %v446_v61 = vmul.f32 0.05, %v2412_v56  ;;  %v407_v5 = vmul.f32 0.016666668, %v2365_v54  ;;  %v406_v55 = vmul.f32 0.016666668, %v2368_v57 }
 0x16b   : > { %1816 = vtanh.f32 %v382_v58  ;;  %1471 = vmatmul.mubr.f32.gmra.mrb[6].mxu1 %v461_v59  ;;  %v463_v1 = vadd.f32 %v447_v60, %v2318_v33 }
 0x16c   : > { %v2419_v63 = vpop.eup %1806  ;;  %v462_v8 = vadd.f32 %v446_v61, %v2312_v32  ;;  %1708 = vmatpush3.bf16.msra.mxu1 %v2244_v12  ;;  %v409_v61 = vmul.f32 0.016666668, %v2373_v62  ;;  %v422_v57 = vadd.f32 %v406_v55, %v2237_v9  ;;  %v410_v62 = vmul.f32 0.016666668, %v2388_v19 }
 0x16d   : > { %v2423_v0 = vpop.eup %1808  ;;  %v449_v4 = vmul.f32 0.05, %v2419_v63  ;;  %1710 = vmatprep.subr.bf16.mxu1 %v2250_v15 }
 0x16e   : > { %1473 = vmatprep.mubr.f32.mxu1 %v462_v8  ;;  %v448_v6 = vmul.f32 0.05, %v2423_v0  ;;  %v426_v55 = vadd.f32 %v410_v62, %v2292_v28 }
 0x16f   : > { %1474 = vmatmul.mubr.f32.gmra.mrb[8].mxu1 %v463_v1  ;;  %v465_v12 = vadd.f32 %v449_v4, %v2328_v35  ;;  %v423_v4 = vadd.f32 %v407_v5, %v2277_v25 }
 0x170   : > { %v2429_v7 = vpop.eup %1810  ;;  %v464_v10 = vadd.f32 %v448_v6, %v2322_v34  ;;  %1712 = vmatpush3.bf16.msra.mxu1 %v2250_v15 }
 0x171   : > { %v2433_v11 = vpop.eup %1812  ;;  %v451_v14 = vmul.f32 0.05, %v2429_v7  ;;  %1714 = vmatprep.subr.bf16.mxu1 %v2256_v18 }
 0x172   : > { %1476 = vmatprep.mubr.f32.mxu1 %v464_v10  ;;  %v450_v16 = vmul.f32 0.05, %v2433_v11 }
 0x173   : > { %1477 = vmatmul.mubr.f32.gmra.mrb[10].mxu1 %v465_v12  ;;  %v467_v15 = vadd.f32 %v451_v14, %v2338_v37  ;;  %v408_v14 = vmul.f32 0.016666668, %v2377_v2  ;;  %v425_v2 = vadd.f32 %v409_v61, %v2288_v27 }
 0x174   : > { %v2439_v17 = vpop.eup %1814  ;;  %v466_v20 = vadd.f32 %v450_v16, %v2332_v36  ;;  %1716 = vmatpush3.bf16.msra.mxu1 %v2256_v18 }
 0x175   : > { %v2443_v22 = vpop.eup %1816  ;;  %v453_v23 = vmul.f32 0.05, %v2439_v17  ;;  %1718 = vmatprep.subr.bf16.mxu1 %v2262_v21 }
 0x176   : > { %1479 = vmatprep.mubr.f32.mxu1 %v466_v20  ;;  %v452_v41 = vmul.f32 0.05, %v2443_v22 }
 0x177   : > { %1480 = vmatmul.mubr.f32.gmra.mrb[12].mxu1 %v467_v15  ;;  %v469_v3 = vadd.f32 %v453_v23, %v2348_v39  ;;  %v411_v15 = vmul.f32 0.016666668, %v2383_v13 }
 0x178   : > { %v468_v42 = vadd.f32 %v452_v41, %v2342_v38  ;;  %1720 = vmatpush3.bf16.msra.mxu1 %v2262_v21 }
 0x179   : > { %1722 = vmatprep.subr.bf16.mxu1 %v2268_v24 }
 0x17a   : > { %1482 = vmatprep.mubr.f32.mxu1 %v468_v42 }
 0x17b   : > { %1483 = vmatmul.mubr.f32.gmra.mrb[14].mxu1 %v469_v3 }
 0x17c   : > { %1724 = vmatpush3.bf16.msra.mxu1 %v2268_v24 }
 0x232   : > { %v1463_v18 = vpop.f32.mrb[0].mxu1 }
 0x233   : > { %v542_v44 = vadd.f32 %v1463_v18, %v2357_v40  ;;  %v536_v45 = vpop.f32.mrb[1].mxu1 }
 0x234   : > { %v537_v47 = vadd.f32 %v2357_v40, %v536_v45 }
 0x235   : > { %1818 = vtanh.f32 %v542_v44 }
 0x236   : > { %1820 = vtanh.f32 %v537_v47  ;;  %v1466_v48 = vpop.f32.mrb[2].mxu1 }
 0x237   : > { %v552_v49 = vadd.f32 %v1466_v48, %v2357_v40  ;;  %v546_v21 = vpop.f32.mrb[3].mxu1 }
 0x238   : > { %v547_v50 = vadd.f32 %v2357_v40, %v546_v21 }
 0x239   : > { %1822 = vtanh.f32 %v552_v49 }
 0x23a   : > { %1824 = vtanh.f32 %v547_v50  ;;  %v1469_v51 = vpop.f32.mrb[4].mxu1  ;;  %v424_v50 = vadd.f32 %v408_v14, %v2281_v26 }
 0x23b   : > { %v562_v24 = vadd.f32 %v1469_v51, %v2357_v40  ;;  %v556_v53 = vpop.f32.mrb[5].mxu1 }
 0x23c   : > { %v557_v58 = vadd.f32 %v2357_v40, %v556_v53  ;;  %v427_v53 = vadd.f32 %v411_v15, %v2298_v29 }
 0x23d   : > { %1826 = vtanh.f32 %v562_v24 }
 0x23e   : > { %1828 = vtanh.f32 %v557_v58  ;;  %v1472_v59 = vpop.f32.mrb[6].mxu1 }
 0x23f   : > { %v1819_v60 = vpop.eup %1818  ;;  %v572_v8 = vadd.f32 %v1472_v59, %v2357_v40  ;;  %v566_v1 = vpop.f32.mrb[7].mxu1  ;;  %v413_v59 = vmul.f32 0.016666668, %v2395_v43 }
 0x240   : > { %v1821_v6 = vpop.eup %1820  ;;  %v664_v54 = vmul.f32 0.05, %v1819_v60  ;;  %v567_v10 = vadd.f32 %v2357_v40, %v566_v1  ;;  %v632_v12 = vmul.f32 0.033333335, %v1819_v60 }
 0x241   : > { %1830 = vtanh.f32 %v572_v8  ;;  %v663_v16 = vmul.f32 0.05, %v1821_v6  ;;  %v631_v20 = vmul.f32 0.033333335, %v1821_v6 }
 0x242   : > { %1832 = vtanh.f32 %v567_v10  ;;  %v1475_v23 = vpop.f32.mrb[8].mxu1  ;;  %v2470_v41 = vadd.f32 %v632_v12, %v423_v4  ;;  %v680_v13 = vadd.f32 %v664_v54, %v2277_v25 }
 0x243   : > { %v1823_v42 = vpop.eup %1822  ;;  %v582_v3 = vadd.f32 %v1475_v23, %v2357_v40  ;;  %v576_v18 = vpop.f32.mrb[9].mxu1  ;;  %v679_v44 = vadd.f32 %v663_v16, %v2237_v9  ;;  %v2474_v45 = vadd.f32 %v631_v20, %v422_v57  ;;  %v412_v57 = vmul.f32 0.016666668, %v2400_v46 }
 0x244   : > { %v1825_v47 = vpop.eup %1824  ;;  %v577_v48 = vadd.f32 %v2357_v40, %v576_v18  ;;  %v666_v19 = vmul.f32 0.05, %v1823_v42  ;;  %v634_v49 = vmul.f32 0.033333335, %v1823_v42  ;;  %v415_v16 = vmul.f32 0.016666668, %v2407_v52 }
 0x245   : > { %1834 = vtanh.f32 %v582_v3  ;;  %1517 = vmatprep.mubr.f32.mxu0 %v679_v44  ;;  %v665_v21 = vmul.f32 0.05, %v1825_v47  ;;  %v633_v51 = vmul.f32 0.033333335, %v1825_v47  ;;  %v414_v20 = vmul.f32 0.016666668, %v2412_v56 }
 0x246   : > { %1836 = vtanh.f32 %v577_v48  ;;  %v1478_v5 = vpop.f32.mrb[10].mxu1  ;;  %1518 = vmatmul.mubr.f32.vlgmr.msra.gmra.mrb[16].mxu0 %v680_v13  ;;  %v2480_v24 = vadd.f32 %v634_v49, %v425_v2  ;;  %v682_v54 = vadd.f32 %v666_v19, %v2288_v27  ;;  %v429_v44 = vadd.f32 %v413_v59, %v2308_v31 }
 0x247   : > { %v1827_v58 = vpop.eup %1826  ;;  %v592_v60 = vadd.f32 %v1478_v5, %v2357_v40  ;;  %v586_v61 = vpop.f32.mrb[11].mxu1  ;;  %v681_v8 = vadd.f32 %v665_v21, %v2281_v26  ;;  %v2487_v1 = vadd.f32 %v633_v51, %v424_v50  ;;  %v428_v19 = vadd.f32 %v412_v57, %v2302_v30 }
 0x248   : > { %v1829_v4 = vpop.eup %1828  ;;  %v587_v6 = vadd.f32 %v2357_v40, %v586_v61  ;;  %v668_v10 = vmul.f32 0.05, %v1827_v58  ;;  %v636_v12 = vmul.f32 0.033333335, %v1827_v58  ;;  %v431_v51 = vadd.f32 %v415_v16, %v2318_v33 }
 0x249   : > { %1838 = vtanh.f32 %v592_v60  ;;  %1520 = vmatprep.mubr.f32.mxu0 %v681_v8  ;;  %v667_v14 = vmul.f32 0.05, %v1829_v4  ;;  %v635_v43 = vmul.f32 0.033333335, %v1829_v4  ;;  %v430_v5 = vadd.f32 %v414_v20, %v2312_v32 }
 0x24a   : > { %1840 = vtanh.f32 %v587_v6  ;;  %v1481_v15 = vpop.f32.mrb[12].mxu1  ;;  %1521 = vmatmul.mubr.f32.gmra.mrb[18].mxu0 %v682_v54  ;;  %v2494_v62 = vadd.f32 %v636_v12, %v427_v53  ;;  %v684_v56 = vadd.f32 %v668_v10, %v2298_v29  ;;  %v416_v12 = vmul.f32 0.016666668, %v2423_v0 }
 0x24b   : > { %v1831_v23 = vpop.eup %1830  ;;  %v602_v42 = vadd.f32 %v1481_v15, %v2357_v40  ;;  %v596_v3 = vpop.f32.mrb[13].mxu1  ;;  %v683_v18 = vadd.f32 %v667_v14, %v2292_v28  ;;  %v2498_v46 = vadd.f32 %v635_v43, %v426_v55  ;;  %v417_v55 = vmul.f32 0.016666668, %v2419_v63 }
 0x24c   : > { %v1833_v2 = vpop.eup %1832  ;;  %v597_v52 = vadd.f32 %v2357_v40, %v596_v3  ;;  %v670_v47 = vmul.f32 0.05, %v1831_v23  ;;  %v638_v48 = vmul.f32 0.033333335, %v1831_v23  ;;  %v419_v16 = vmul.f32 0.016666668, %v2429_v7 }
 0x24d   : > { %1842 = vtanh.f32 %v602_v42  ;;  %1523 = vmatprep.mubr.f32.mxu0 %v683_v18  ;;  %v669_v13 = vmul.f32 0.05, %v1833_v2  ;;  %v637_v49 = vmul.f32 0.033333335, %v1833_v2  ;;  %v433_v0 = vadd.f32 %v417_v55, %v2328_v35 }
 0x24e   : > { %1844 = vtanh.f32 %v597_v52  ;;  %v1484_v21 = vpop.f32.mrb[14].mxu1  ;;  %1524 = vmatmul.mubr.f32.gmra.mrb[20].mxu0 %v684_v56  ;;  %v2504_v50 = vadd.f32 %v638_v48, %v429_v44  ;;  %v686_v6 = vadd.f32 %v670_v47, %v2308_v31  ;;  %v418_v44 = vmul.f32 0.016666668, %v2433_v11 }
 0x24f   : > { %v1835_v53 = vpop.eup %1834  ;;  %v612_v58 = vadd.f32 %v1484_v21, %v2357_v40  ;;  %v606_v59 = vpop.f32.mrb[15].mxu1  ;;  %v685_v60 = vadd.f32 %v669_v13, %v2302_v30  ;;  %v2511_v61 = vadd.f32 %v637_v49, %v428_v19  ;;  %v432_v52 = vadd.f32 %v416_v12, %v2322_v34 }
 0x250   : > { %v1837_v8 = vpop.eup %1836  ;;  %v607_v4 = vadd.f32 %v2357_v40, %v606_v59  ;;  %v672_v54 = vmul.f32 0.05, %v1835_v53  ;;  %v640_v10 = vmul.f32 0.033333335, %v1835_v53  ;;  %v435_v19 = vadd.f32 %v419_v16, %v2338_v37 }
 0x251   : > { %1846 = vtanh.f32 %v612_v58  ;;  %1526 = vmatprep.mubr.f32.mxu0 %v685_v60  ;;  %v671_v57 = vmul.f32 0.05, %v1837_v8  ;;  %v639_v63 = vmul.f32 0.033333335, %v1837_v8  ;;  %v421_v21 = vmul.f32 0.016666668, %v2439_v17 }
 0x252   : > { %1848 = vtanh.f32 %v607_v4  ;;  %1527 = vmatmul.mubr.f32.gmra.mrb[22].mxu0 %v686_v6  ;;  %v2516_v14 = vadd.f32 %v640_v10, %v431_v51  ;;  %v688_v42 = vadd.f32 %v672_v54, %v2318_v33  ;;  %v420_v53 = vmul.f32 0.016666668, %v2443_v22 }
 0x253   : > { %v1839_v43 = vpop.eup %1838  ;;  %v687_v20 = vadd.f32 %v671_v57, %v2312_v32  ;;  %v2520_v15 = vadd.f32 %v639_v63, %v430_v5  ;;  %v434_v58 = vadd.f32 %v418_v44, %v2332_v36  ;;  %v437_v12 = vadd.f32 %v421_v21, %v2348_v39 }
 0x254   : > { %v1841_v23 = vpop.eup %1840  ;;  %v674_v3 = vmul.f32 0.05, %v1839_v43  ;;  %v642_v18 = vmul.f32 0.033333335, %v1839_v43  ;;  %v436_v63 = vadd.f32 %v420_v53, %v2342_v38 }
 0x255   : > { %1529 = vmatprep.mubr.f32.mxu0 %v687_v20  ;;  %v673_v2 = vmul.f32 0.05, %v1841_v23  ;;  %v641_v56 = vmul.f32 0.033333335, %v1841_v23 }
 0x256   : > { %1530 = vmatmul.mubr.f32.gmra.mrb[24].mxu0 %v688_v42  ;;  %v2526_v7 = vadd.f32 %v642_v18, %v433_v0  ;;  %v690_v11 = vadd.f32 %v674_v3, %v2328_v35 }
 0x257   : > { %v1843_v47 = vpop.eup %1842  ;;  %v689_v48 = vadd.f32 %v673_v2, %v2322_v34  ;;  %v2529_v13 = vadd.f32 %v641_v56, %v432_v52 }
 0x258   : > { %v1845_v49 = vpop.eup %1844  ;;  %v676_v51 = vmul.f32 0.05, %v1843_v47  ;;  %v644_v5 = vmul.f32 0.033333335, %v1843_v47 }
 0x259   : > { %1532 = vmatprep.mubr.f32.mxu0 %v689_v48  ;;  %v675_v55 = vmul.f32 0.05, %v1845_v49  ;;  %v643_v59 = vmul.f32 0.033333335, %v1845_v49 }
 0x25a   : > { %1533 = vmatmul.mubr.f32.gmra.mrb[26].mxu0 %v690_v11  ;;  %v2536_v60 = vadd.f32 %v644_v5, %v435_v19  ;;  %v692_v54 = vadd.f32 %v676_v51, %v2338_v37 }
 0x25b   : > { %v1847_v8 = vpop.eup %1846  ;;  %v691_v4 = vadd.f32 %v675_v55, %v2332_v36  ;;  %v2539_v6 = vadd.f32 %v643_v59, %v434_v58 }
 0x25c   : > { %v1849_v17 = vpop.eup %1848  ;;  %v678_v10 = vmul.f32 0.05, %v1847_v8  ;;  %v646_v22 = vmul.f32 0.033333335, %v1847_v8 }
 0x25d   : > { %1535 = vmatprep.mubr.f32.mxu0 %v691_v4  ;;  %v677_v57 = vmul.f32 0.05, %v1849_v17  ;;  %v645_v43 = vmul.f32 0.033333335, %v1849_v17 }
 0x25e   : > { %1536 = vmatmul.mubr.f32.gmra.mrb[28].mxu0 %v692_v54  ;;  %v2544_v16 = vadd.f32 %v646_v22, %v437_v12  ;;  %v694_v42 = vadd.f32 %v678_v10, %v2348_v39 }
 0x25f   : > { %v693_v20 = vadd.f32 %v677_v57, %v2342_v38  ;;  %v2547_v23 = vadd.f32 %v645_v43, %v436_v63 }
 0x261   : > { %1538 = vmatprep.mubr.f32.mxu0 %v693_v20 }
 0x262   : > { %1539 = vmatmul.mubr.f32.gmra.mrb[30].mxu0 %v694_v42 }
 0x319   : > { %v1519_v3 = vpop.f32.mrb[16].mxu0 }
 0x31a   : > { %v767_v0 = vadd.f32 %v1519_v3, %v2357_v40  ;;  %v761_v18 = vpop.f32.mrb[17].mxu0 }
 0x31b   : > { %v762_v44 = vadd.f32 %v2357_v40, %v761_v18 }
 0x31c   : > { %1850 = vtanh.f32 %v767_v0 }
 0x31d   : > { %1852 = vtanh.f32 %v762_v44  ;;  %v1522_v2 = vpop.f32.mrb[18].mxu0 }
 0x31e   : > { %v777_v52 = vadd.f32 %v1522_v2, %v2357_v40  ;;  %v771_v56 = vpop.f32.mrb[19].mxu0 }
 0x31f   : > { %v772_v47 = vadd.f32 %v2357_v40, %v771_v56 }
 0x320   : > { %1854 = vtanh.f32 %v777_v52 }
 0x321   : > { %1856 = vtanh.f32 %v772_v47  ;;  %v1525_v48 = vpop.f32.mrb[20].mxu0 }
 0x322   : > { %v787_v19 = vadd.f32 %v1525_v48, %v2357_v40  ;;  %v781_v49 = vpop.f32.mrb[21].mxu0 }
 0x323   : > { %v782_v21 = vadd.f32 %v2357_v40, %v781_v49 }
 0x324   : > { %1858 = vtanh.f32 %v787_v19 }
 0x325   : > { %1860 = vtanh.f32 %v782_v21  ;;  %v1528_v11 = vpop.f32.mrb[22].mxu0 }
 0x326   : > { %v1851_v51 = vpop.eup %1850  ;;  %v797_v5 = vadd.f32 %v1528_v11, %v2357_v40  ;;  %v791_v53 = vpop.f32.mrb[23].mxu0 }
 0x327   : > { %v1853_v55 = vpop.eup %1852  ;;  %v889_v58 = vmul.f32 0.1, %v1851_v51  ;;  %v792_v59 = vadd.f32 %v2357_v40, %v791_v53  ;;  %v857_v8 = vmul.f32 0.033333335, %v1851_v51 }
 0x328   : > { %1862 = vtanh.f32 %v797_v5  ;;  %v888_v4 = vmul.f32 0.1, %v1853_v55  ;;  %v856_v17 = vmul.f32 0.033333335, %v1853_v55 }
 0x329   : > { %1864 = vtanh.f32 %v792_v59  ;;  %v1531_v54 = vpop.f32.mrb[24].mxu0  ;;  %v2559_v10 = vadd.f32 %v857_v8, %v2470_v41  ;;  %v905_v3 = vadd.f32 %v889_v58, %v2277_v25 }
 0x32a   : > { %v1855_v12 = vpop.eup %1854  ;;  %v807_v22 = vadd.f32 %v1531_v54, %v2357_v40  ;;  %v801_v57 = vpop.f32.mrb[25].mxu0  ;;  %v904_v63 = vadd.f32 %v888_v4, %v2237_v9  ;;  %v2564_v43 = vadd.f32 %v856_v17, %v2474_v45 }
 0x32b   : > { %v1857_v20 = vpop.eup %1856  ;;  %v802_v42 = vadd.f32 %v2357_v40, %v801_v57  ;;  %v891_v0 = vmul.f32 0.1, %v1855_v12  ;;  %v859_v18 = vmul.f32 0.033333335, %v1855_v12 }
 0x32c   : > { %1866 = vtanh.f32 %v807_v22  ;;  %1573 = vmatprep.mubr.f32.mxu1 %v904_v63  ;;  %v890_v41 = vmul.f32 0.1, %v1857_v20  ;;  %v858_v44 = vmul.f32 0.033333335, %v1857_v20 }
 0x32d   : > { %1868 = vtanh.f32 %v802_v42  ;;  %v1534_v2 = vpop.f32.mrb[26].mxu0  ;;  %1574 = vmatmul.mubr.f32.vlgmr.msra.gmra.mrb[16].mxu1 %v905_v3  ;;  %v2569_v52 = vadd.f32 %v859_v18, %v2480_v24  ;;  %v907_v49 = vadd.f32 %v891_v0, %v2288_v27 }
 0x32e   : > { %v1859_v9 = vpop.eup %1858  ;;  %v817_v45 = vadd.f32 %v1534_v2, %v2357_v40  ;;  %v811_v56 = vpop.f32.mrb[27].mxu0  ;;  %v906_v47 = vadd.f32 %v890_v41, %v2281_v26  ;;  %v2574_v25 = vadd.f32 %v858_v44, %v2487_v1 }
 0x32f   : > { %v1861_v48 = vpop.eup %1860  ;;  %v812_v19 = vadd.f32 %v2357_v40, %v811_v56  ;;  %v893_v21 = vmul.f32 0.1, %v1859_v9  ;;  %v861_v11 = vmul.f32 0.033333335, %v1859_v9 }
 0x330   : > { %1870 = vtanh.f32 %v817_v45  ;;  %1576 = vmatprep.mubr.f32.mxu1 %v906_v47  ;;  %v892_v24 = vmul.f32 0.1, %v1861_v48  ;;  %v860_v51 = vmul.f32 0.033333335, %v1861_v48 }
 0x331   : > { %1872 = vtanh.f32 %v812_v19  ;;  %v1537_v5 = vpop.f32.mrb[28].mxu0  ;;  %1577 = vmatmul.mubr.f32.gmra.mrb[18].mxu1 %v907_v49  ;;  %v2579_v53 = vadd.f32 %v861_v11, %v2494_v62  ;;  %v909_v4 = vadd.f32 %v893_v21, %v2298_v29 }
 0x332   : > { %v1863_v26 = vpop.eup %1862  ;;  %v827_v1 = vadd.f32 %v1537_v5, %v2357_v40  ;;  %v821_v55 = vpop.f32.mrb[29].mxu0  ;;  %v908_v58 = vadd.f32 %v892_v24, %v2292_v28  ;;  %v2584_v27 = vadd.f32 %v860_v51, %v2498_v46 }
 0x333   : > { %v1865_v59 = vpop.eup %1864  ;;  %v822_v8 = vadd.f32 %v2357_v40, %v821_v55  ;;  %v895_v17 = vmul.f32 0.1, %v1863_v26  ;;  %v863_v54 = vmul.f32 0.033333335, %v1863_v26 }
 0x334   : > { %1874 = vtanh.f32 %v827_v1  ;;  %1579 = vmatprep.mubr.f32.mxu1 %v908_v58  ;;  %v894_v62 = vmul.f32 0.1, %v1865_v59  ;;  %v862_v12 = vmul.f32 0.033333335, %v1865_v59 }
 0x335   : > { %1876 = vtanh.f32 %v822_v8  ;;  %v1540_v22 = vpop.f32.mrb[30].mxu0  ;;  %1580 = vmatmul.mubr.f32.gmra.mrb[20].mxu1 %v909_v4  ;;  %v2589_v57 = vadd.f32 %v863_v54, %v2504_v50  ;;  %v911_v0 = vadd.f32 %v895_v17, %v2308_v31 }
 0x336   : > { %v1867_v28 = vpop.eup %1866  ;;  %v837_v46 = vadd.f32 %v1540_v22, %v2357_v40  ;;  %v831_v63 = vpop.f32.mrb[31].mxu0  ;;  %v910_v20 = vadd.f32 %v894_v62, %v2302_v30  ;;  %v2594_v29 = vadd.f32 %v862_v12, %v2511_v61 }
 0x337   : > { %v1869_v42 = vpop.eup %1868  ;;  %v832_v3 = vadd.f32 %v2357_v40, %v831_v63  ;;  %v897_v18 = vmul.f32 0.1, %v1867_v28  ;;  %v865_v41 = vmul.f32 0.033333335, %v1867_v28 }
 0x338   : > { %1878 = vtanh.f32 %v837_v46  ;;  %1582 = vmatprep.mubr.f32.mxu1 %v910_v20  ;;  %v896_v50 = vmul.f32 0.1, %v1869_v42  ;;  %v864_v44 = vmul.f32 0.033333335, %v1869_v42 }
 0x339   : > { %1880 = vtanh.f32 %v832_v3  ;;  %1583 = vmatmul.mubr.f32.gmra.mrb[22].mxu1 %v911_v0  ;;  %v2599_v2 = vadd.f32 %v865_v41, %v2516_v14  ;;  %v913_v31 = vadd.f32 %v897_v18, %v2318_v33 }
 0x33a   : > { %v1871_v30 = vpop.eup %1870  ;;  %v912_v61 = vadd.f32 %v896_v50, %v2312_v32  ;;  %v2603_v9 = vadd.f32 %v864_v44, %v2520_v15 }
 0x33b   : > { %v1873_v45 = vpop.eup %1872  ;;  %v899_v56 = vmul.f32 0.1, %v1871_v30  ;;  %v867_v47 = vmul.f32 0.033333335, %v1871_v30 }
 0x33c   : > { %1585 = vmatprep.mubr.f32.mxu1 %v912_v61  ;;  %v898_v48 = vmul.f32 0.1, %v1873_v45  ;;  %v866_v19 = vmul.f32 0.033333335, %v1873_v45 }
 0x33d   : > { %1586 = vmatmul.mubr.f32.gmra.mrb[24].mxu1 %v913_v31  ;;  %v2607_v49 = vadd.f32 %v867_v47, %v2526_v7  ;;  %v915_v11 = vadd.f32 %v899_v56, %v2328_v35 }
 0x33e   : > { %v1875_v14 = vpop.eup %1874  ;;  %v914_v21 = vadd.f32 %v898_v48, %v2322_v34  ;;  %v2611_v32 = vadd.f32 %v866_v19, %v2529_v13 }
 0x33f   : > { %v1877_v15 = vpop.eup %1876  ;;  %v901_v24 = vmul.f32 0.1, %v1875_v14  ;;  %v869_v33 = vmul.f32 0.033333335, %v1875_v14 }
 0x340   : > { %1588 = vmatprep.mubr.f32.mxu1 %v914_v21  ;;  %v900_v51 = vmul.f32 0.1, %v1877_v15  ;;  %v868_v5 = vmul.f32 0.033333335, %v1877_v15 }
 0x341   : > { %1589 = vmatmul.mubr.f32.gmra.mrb[26].mxu1 %v915_v11  ;;  %v2615_v26 = vadd.f32 %v869_v33, %v2536_v60  ;;  %v917_v55 = vadd.f32 %v901_v24, %v2338_v37 }
 0x342   : > { %v1879_v7 = vpop.eup %1878  ;;  %v916_v1 = vadd.f32 %v900_v51, %v2332_v36  ;;  %v2619_v34 = vadd.f32 %v868_v5, %v2539_v6 }
 0x343   : > { %v1881_v13 = vpop.eup %1880  ;;  %v903_v58 = vmul.f32 0.1, %v1879_v7  ;;  %v871_v35 = vmul.f32 0.033333335, %v1879_v7 }
 0x344   : > { %1591 = vmatprep.mubr.f32.mxu1 %v916_v1  ;;  %v902_v59 = vmul.f32 0.1, %v1881_v13  ;;  %v870_v8 = vmul.f32 0.033333335, %v1881_v13 }
 0x345   : > { %1592 = vmatmul.mubr.f32.gmra.mrb[28].mxu1 %v917_v55  ;;  %v2623_v4 = vadd.f32 %v871_v35, %v2544_v16  ;;  %v919_v36 = vadd.f32 %v903_v58, %v2348_v39 }
 0x346   : > { %v918_v60 = vadd.f32 %v902_v59, %v2342_v38  ;;  %v2627_v17 = vadd.f32 %v870_v8, %v2547_v23  ;;  %v1914_v8 = vld [vmem:[%s2734_s2] ss:$0 sm:$0xff] }
 0x348   : > { %1594 = vmatprep.mubr.f32.mxu1 %v918_v60 }
 0x349   : > { %1595 = vmatmul.mubr.f32.gmra.mrb[30].mxu1 %v919_v36 }
 0x400   : > { %v1575_v6 = vpop.f32.mrb[16].mxu1 }
 0x401   : > { %v992_v37 = vadd.f32 %v1575_v6, %v2357_v40  ;;  %v986_v54 = vpop.f32.mrb[17].mxu1 }
 0x402   : > { %v987_v62 = vadd.f32 %v2357_v40, %v986_v54 }
 0x403   : > { %1882 = vtanh.f32 %v992_v37 }
 0x404   : > { %1884 = vtanh.f32 %v987_v62  ;;  %v1578_v12 = vpop.f32.mrb[18].mxu1 }
 0x405   : > { %v1002_v16 = vadd.f32 %v1578_v12, %v2357_v40  ;;  %v996_v22 = vpop.f32.mrb[19].mxu1 }
 0x406   : > { %v997_v38 = vadd.f32 %v2357_v40, %v996_v22 }
 0x407   : > { %1886 = vtanh.f32 %v1002_v16 }
 0x408   : > { %1888 = vtanh.f32 %v997_v38  ;;  %v1581_v23 = vpop.f32.mrb[20].mxu1 }
 0x409   : > { %v1012_v39 = vadd.f32 %v1581_v23, %v2357_v40  ;;  %v1006_v28 = vpop.f32.mrb[21].mxu1 }
 0x40a   : > { %v1007_v46 = vadd.f32 %v2357_v40, %v1006_v28 }
 0x40b   : > { %1890 = vtanh.f32 %v1012_v39 }
 0x40c   : > { %1892 = vtanh.f32 %v1007_v46  ;;  %v1584_v63 = vpop.f32.mrb[22].mxu1 }
 0x40d   : > { %v1883_v20 = vpop.eup %1882  ;;  %v1022_v42 = vadd.f32 %v1584_v63, %v2357_v40  ;;  %v1016_v3 = vpop.f32.mrb[23].mxu1 }
 0x40e   : > { %v1885_v0 = vpop.eup %1884  ;;  %v1082_v18 = vmul.f32 0.016666668, %v1883_v20  ;;  %v1017_v41 = vadd.f32 %v2357_v40, %v1016_v3 }
 0x40f   : > { %v1081_v50 = vmul.f32 0.016666668, %v1885_v0  ;;  %1894 = vtanh.f32 %v1022_v42 }
 0x410   : > { %v1098_v44 = vadd.f32 %v1082_v18, %v2559_v10  ;;  %1896 = vtanh.f32 %v1017_v41  ;;  %v1587_v30 = vpop.f32.mrb[24].mxu1 }
 0x411   : > { %v1887_v61 = vpop.eup %1886  ;;  %v1097_v45 = vadd.f32 %v1081_v50, %v2564_v43  ;;  %v1032_v31 = vadd.f32 %v1587_v30, %v2357_v40  ;;  %v1026_v56 = vpop.f32.mrb[25].mxu1 }
 0x412   : > { %v1889_v47 = vpop.eup %1888  ;;  %1114 = vst [vmem:[%s2643_s8 + $0x8] sm:$0xff] %v1098_v44  ;;  %v1084_v48 = vmul.f32 0.016666668, %v1887_v61  ;;  %v1027_v10 = vadd.f32 %v2357_v40, %v1026_v56 }
 0x413   : > { %1113 = vst [vmem:[%s2643_s8] sm:$0xff] %v1097_v45  ;;  %v1083_v19 = vmul.f32 0.016666668, %v1889_v47  ;;  %1898 = vtanh.f32 %v1032_v31 }
 0x414   : > { %v1100_v43 = vadd.f32 %v1084_v48, %v2569_v52  ;;  %1900 = vtanh.f32 %v1027_v10  ;;  %v1590_v14 = vpop.f32.mrb[26].mxu1 }
 0x415   : > { %v1891_v21 = vpop.eup %1890  ;;  %v1099_v15 = vadd.f32 %v1083_v19, %v2574_v25  ;;  %v1042_v11 = vadd.f32 %v1590_v14, %v2357_v40  ;;  %v1036_v24 = vpop.f32.mrb[27].mxu1 }
 0x416   : > { %v1893_v33 = vpop.eup %1892  ;;  %1116 = vst [vmem:[%s2643_s8 + $0x18] sm:$0xff] %v1100_v43  ;;  %v1086_v51 = vmul.f32 0.016666668, %v1891_v21  ;;  %v1037_v5 = vadd.f32 %v2357_v40, %v1036_v24 }
 0x417   : > { %1115 = vst [vmem:[%s2643_s8 + $0x10] sm:$0xff] %v1099_v15  ;;  %v1085_v7 = vmul.f32 0.016666668, %v1893_v33  ;;  %1902 = vtanh.f32 %v1042_v11 }
 0x418   : > { %v1102_v52 = vadd.f32 %v1086_v51, %v2579_v53  ;;  %1904 = vtanh.f32 %v1037_v5  ;;  %v1593_v1 = vpop.f32.mrb[28].mxu1 }
 0x419   : > { %v1895_v13 = vpop.eup %1894  ;;  %v1101_v25 = vadd.f32 %v1085_v7, %v2584_v27  ;;  %v1052_v55 = vadd.f32 %v1593_v1, %v2357_v40  ;;  %v1046_v58 = vpop.f32.mrb[29].mxu1 }
 0x41a   : > { %v1897_v35 = vpop.eup %1896  ;;  %1118 = vst [vmem:[%s2643_s8 + $0x28] sm:$0xff] %v1102_v52  ;;  %v1088_v59 = vmul.f32 0.016666668, %v1895_v13  ;;  %v1047_v60 = vadd.f32 %v1914_v8, %v1046_v58 }
 0x41b   : > { %1117 = vst [vmem:[%s2643_s8 + $0x20] sm:$0xff] %v1101_v25  ;;  %v1087_v53 = vmul.f32 0.016666668, %v1897_v35  ;;  %1906 = vtanh.f32 %v1052_v55 }
 0x41c   : > { %v1104_v36 = vadd.f32 %v1088_v59, %v2589_v57  ;;  %1908 = vtanh.f32 %v1047_v60  ;;  %v1596_v27 = vpop.f32.mrb[30].mxu1 }
 0x41d   : > { %v1899_v6 = vpop.eup %1898  ;;  %v1103_v40 = vadd.f32 %v1087_v53, %v2594_v29  ;;  %v1062_v37 = vadd.f32 %v1914_v8, %v1596_v27  ;;  %v1056_v54 = vpop.f32.mrb[31].mxu1 }
 0x41e   : > { %v1901_v62 = vpop.eup %1900  ;;  %1120 = vst [vmem:[%s2643_s8 + $0x38] sm:$0xff] %v1104_v36  ;;  %v1090_v12 = vmul.f32 0.016666668, %v1899_v6  ;;  %v1057_v16 = vadd.f32 %v1914_v8, %v1056_v54 }
 0x41f   : > { %1119 = vst [vmem:[%s2643_s8 + $0x30] sm:$0xff] %v1103_v40  ;;  %v1089_v22 = vmul.f32 0.016666668, %v1901_v62  ;;  %1910 = vtanh.f32 %v1062_v37 }
 0x420   : > { %v1106_v57 = vadd.f32 %v1090_v12, %v2599_v2  ;;  %1912 = vtanh.f32 %v1057_v16 }
 0x421   : > { %v1903_v38 = vpop.eup %1902  ;;  %v1105_v23 = vadd.f32 %v1089_v22, %v2603_v9 }
 0x422   : > { %v1905_v39 = vpop.eup %1904  ;;  %1122 = vst [vmem:[%s2643_s8 + $0x48] sm:$0xff] %v1106_v57  ;;  %v1092_v29 = vmul.f32 0.016666668, %v1903_v38 }
 0x423   : > { %1121 = vst [vmem:[%s2643_s8 + $0x40] sm:$0xff] %v1105_v23  ;;  %v1091_v28 = vmul.f32 0.016666668, %v1905_v39 }
 0x424   : > { %v1108_v46 = vadd.f32 %v1092_v29, %v2607_v49 }
 0x425   : > { %v1907_v63 = vpop.eup %1906  ;;  %v1107_v20 = vadd.f32 %v1091_v28, %v2611_v32 }
 0x426   : > { %v1909_v42 = vpop.eup %1908  ;;  %1124 = vst [vmem:[%s2643_s8 + $0x58] sm:$0xff] %v1108_v46  ;;  %v1094_v2 = vmul.f32 0.016666668, %v1907_v63 }
 0x427   : > { %1123 = vst [vmem:[%s2643_s8 + $0x50] sm:$0xff] %v1107_v20  ;;  %v1093_v9 = vmul.f32 0.016666668, %v1909_v42 }
 0x428   : > { %v1110_v3 = vadd.f32 %v1094_v2, %v2615_v26 }
 0x429   : > { %v1911_v0 = vpop.eup %1910  ;;  %v1109_v18 = vadd.f32 %v1093_v9, %v2619_v34 }
 0x42a   : > { %v1913_v49 = vpop.eup %1912  ;;  %1126 = vst [vmem:[%s2643_s8 + $0x68] sm:$0xff] %v1110_v3  ;;  %v1096_v41 = vmul.f32 0.016666668, %v1911_v0 }
 0x42b   : > { %1125 = vst [vmem:[%s2643_s8 + $0x60] sm:$0xff] %v1109_v18  ;;  %v1095_v32 = vmul.f32 0.016666668, %v1913_v49 }
 0x42c   : > { %v1112_v50 = vadd.f32 %v1096_v41, %v2623_v4 }
 0x42d   : > { %v1111_v26 = vadd.f32 %v1095_v32, %v2627_v17 }
 0x42e   : > { %1128 = vst [vmem:[%s2643_s8 + $0x78] sm:$0xff] %v1112_v50 }
 0x42f   : > { %1127 = vst [vmem:[%s2643_s8 + $0x70] sm:$0xff] %v1111_v26 }
 0x430   : > { %1986 = shalt.err (!%p1983_p7)
}
 0x431   : > { %s1987_s7 = scalar_lea.hbm %s2684_s28, 2048  ;;  %s1991_s18 = scalar_lea.hbm %s2735_s3, 8192 }
 0x432   : > { %p1988_p9 = scmp.ne.s32.totalorder %s2684_s28, %s1987_s7  ;;  %p1992_p5 = scmp.lt.u32.totalorder %s2684_s28, %s2735_s3 }
 0x433   : > { %p1993_p10 = scmp.lt.u32.totalorder %s1991_s18, %s1987_s7  ;;  %p1995_p4 = scmp.lt.u32.totalorder %s1987_s7, %s2684_s28 }
 0x434   : > { %p1989_p1 = pnand %p1988_p9, %p2158_p12 }
 0x435   : > { %p1994_p2 = por %p1993_p10, %p1992_p5 }
 0x436   : > { %p1990_p0 = pneg %p1989_p1 }
 0x437   : > { %p1996_p6 = por %p1995_p4, %p1994_p2 }
 0x439   : > { %p1997_p8 = pnand %p1996_p6, %p1990_p0 }
 0x43b   : > { %2000 = shalt.err (!%p1997_p8)
}
 0x43c   : > { %s2050_s9 = smov 128   ;;  %s2051_s4 = smov 8  }
 0x43d   : > { %1731 = dma.vmem_to_hbm [thread:$0]  (%p2158_p12), %s2686_s5, 2048, %s2684_s28, %s1130_s16, %s2050_s9, %s2050_s9, %s2051_s4  }
 0x43e PF: > { %p1748_p11 = scmp.ge.s32.totalorder %s2043_s15, 2  ;;  %s1158_s25 = sand.u32 1, %s2031_s12  }
 0x43f   : > { %p2750_p13 = scmp.ne.s32.totalorder %s2740_s19, 0  ;;  %s1159_s11 = scalar_lea.sflag [#allocation4], %s1158_s25 }
 0x441   : > { %p1742_p3 = pnand %p1748_p11, %p2750_p13 }
 0x443   : > { %2026 = dma.done.wait (!%p1742_p3), %s1159_s11, 2048  }
 0x444   : > { %2028 = vsyncadd (!%p1742_p3), %s1159_s11, 4294965248  ;;  %p17_p7 = scmp.ge.s32.totalorder %s2125_s24, 6   ;;  %s2751_s12 = smov %s2035_s13 }
 0x445   : > { %s2752_s13 = smov %s2039_s14  ;;  %s2753_s14 = smov %s2154_s17 }
 0x446   : > { %s2754_s15 = smov %s2125_s24  ;;  %19 = sbr.rel (!%p17_p7) target bundleno = 6 (0x6), region = 81 }
 0x44d   :  { %1164 = vsyncpa [#allocation3], 1 }
 0x44e   :  { %1166 = vsyncpa [#allocation3 + $0x1], 1 }
 0x44f   :  { %1167 = vsyncpa [#allocation6], 1 }
 0x450   :  { %1168 = vsyncpa [#allocation4], 1 }
 0x451   :  { %1170 = vsyncpa [#allocation4 + $0x1], 1 }

</bundles_post_ra>
